<compile_context>
chip_gen: v7x
topology: tpu7x:2x2x1
jax: 0.10.0
libtpu: 0.0.40
codegen_flags: <defaults>
</compile_context>

<pallas_src>
import functools

import jax
import jax.numpy as jnp
from jax.experimental import pallas as pl
from jax.experimental.pallas import tpu as pltpu


def _cls_query_attn_kernel(x_ref, q_ref, wkv_ref, out_ref, attn_ref, *,
                           scale, bt, n, dh):
    # x_ref:    (bt*n, D)   Bt batch rows of x, flattened along the row axis
    # q_ref:    (H, dh)     precomputed cls @ Wq (batch-invariant)
    # wkv_ref:  (D, 2*dh)   fused [Wk | Wv] (pre-transposed)
    # out_ref:  (bt, H, dh)
    # attn_ref: (bt, H, n)

    # Fused K/V projection: one MXU pass over all Bt*N rows.
    kv = jnp.dot(x_ref[...], wkv_ref[...],
                 preferred_element_type=jnp.float32)          # (bt*n, 2*dh)
    kv = kv.reshape(bt, n, 2 * dh)                            # split leading rows back per batch
    k = kv[..., :dh]                                          # (bt, n, dh)
    v = kv[..., dh:]                                          # (bt, n, dh)

    q = q_ref[...]                                            # (H, dh)
    qb = jnp.broadcast_to(q, (bt,) + q.shape)                 # (bt, H, dh)

    # Scores: contraction over the feature axis of both operands (no k.T materialized).
    dots = jnp.einsum('bhd,bnd->bhn', qb, k,
                      preferred_element_type=jnp.float32) * scale   # (bt, H, n)

    # Numerically-stable softmax over the key axis (matches torch.Softmax(dim=-1)).
    m = jnp.max(dots, axis=-1, keepdims=True)
    p = jnp.exp(dots - m)
    attn = p * pl.reciprocal(jnp.sum(p, axis=-1, keepdims=True), approx=True)

    out = jnp.einsum('bhn,bnd->bhd', attn, v,
                     preferred_element_type=jnp.float32)      # (bt, H, dh)

    out_ref[...] = out.astype(out_ref.dtype)
    attn_ref[...] = attn.astype(attn_ref.dtype)


def _pick_block_b(batch, seq):
    """Largest batch tile that (a) divides the batch, (b) keeps the fused K/V
    projection around <=128 rows, and (c) leaves >=2 grid steps when the batch
    allows it (v7x shards a 'parallel' grid axis across its 2 TensorCores)."""
    target = max(1, 128 // max(seq, 1))
    best = 1
    for cand in range(1, batch + 1):
        if batch % cand != 0:
            continue
        if cand > target:
            continue
        if batch >= 2 and (batch // cand) < 2:
            continue
        best = cand
    return best


def cls_query_attention(x, cls_token, wq_t, wk_t, wv_t, *, scale, block_b=None):
    """x: (B, N, D); cls_token: (H, D); w*_t: (D, Dh) pre-transposed weights."""
    B, N, D = x.shape
    H, Dc = cls_token.shape
    Dh = wq_t.shape[1]
    assert wq_t.shape == (D, Dh) and wk_t.shape == (D, Dh) and wv_t.shape == (D, Dh)
    # The module feeds cls_token into Linear(dim, dim_head): only valid when its
    # last dim equals the contraction dim D (i.e. dim == dim_head in the module).
    assert Dc == D, "cls_token last dim must equal `dim` (module requires dim == dim_head)"

    if block_b is None:
        block_b = _pick_block_b(B, N)
    assert B % block_b == 0
    grid_b = B // block_b

    # Hoisted, batch-invariant query projection (was recomputed every grid step before).
    q = jnp.dot(cls_token, wq_t, preferred_element_type=jnp.float32)      # (H, Dh)
    # Fused K/V weight -> one projection matmul per grid step.
    wkv_t = jnp.concatenate([wk_t, wv_t], axis=1)                         # (D, 2*Dh)
    # Flatten (B, N) rows so the kernel sees a dense (Bt*N, D) slab (no in-kernel
    # reshape of the input needed; leading-dim collapse is layout-free).
    x2d = x.reshape(B * N, D)

    kernel = functools.partial(_cls_query_attn_kernel,
                               scale=scale, bt=block_b, n=N, dh=Dh)

    out, attn = pl.pallas_call(
        kernel,
        out_shape=(
            jax.ShapeDtypeStruct((B, H, Dh), jnp.float32),
            jax.ShapeDtypeStruct((B, H, N), jnp.float32),
        ),
        grid=(grid_b,),
        in_specs=[
            pl.BlockSpec((block_b * N, D), lambda i: (i, 0)),   # x rows for Bt batch elems
            pl.BlockSpec((H, Dh), lambda i: (0, 0)),            # precomputed q (shared)
            pl.BlockSpec((D, 2 * Dh), lambda i: (0, 0)),        # fused [Wk|Wv]^T (shared)
        ],
        out_specs=(
            pl.BlockSpec((block_b, H, Dh), lambda i: (i, 0, 0)),  # out
            pl.BlockSpec((block_b, H, N), lambda i: (i, 0, 0)),   # attn
        ),
        compiler_params=pltpu.CompilerParams(
            dimension_semantics=("parallel",)),
    )(x2d, q, wkv_t)
    return out, attn


def _reference(x, cls_token, wq_t, wk_t, wv_t, scale):
    # Pure-JAX reference mirroring the PyTorch forward.
    B = x.shape[0]
    cls_b = jnp.broadcast_to(cls_token[None], (B,) + cls_token.shape)   # (B, H, D)
    q = cls_b @ wq_t                                                    # (B, H, Dh)
    k = x @ wk_t                                                        # (B, N, Dh)
    v = x @ wv_t                                                        # (B, N, Dh)
    dots = jnp.einsum("bhd,bnd->bhn", q, k) * scale
    attn = jax.nn.softmax(dots, axis=-1)
    out = jnp.einsum("bhn,bnd->bhd", attn, v)
    return out, attn


if __name__ == "__main__":
    # Small shapes consistent with the module (dim == dim_head == dim_mlp -> to_out = Identity).
    # B=16, N=16 lets each grid step carry Bt=8 batch rows (Bt*N = 128 projection rows)
    # while keeping a 2-step "parallel" grid (one step per v7x TensorCore).
    B, N = 16, 16
    DIM = DIM_HEAD = DIM_MLP = 32
    HEADS = 8
    scale = DIM ** (-0.5)

    key = jax.random.PRNGKey(0)
    k_x, k_cls, k_q, k_k, k_v = jax.random.split(key, 5)

    x = jax.random.normal(k_x, (B, N, DIM), dtype=jnp.float32)
    # PyTorch Linear weight is (out, in); store that way, then pass the transpose (in, out).
    cls_token = jax.random.normal(k_cls, (HEADS, DIM_HEAD), dtype=jnp.float32)
    wq = jax.random.normal(k_q, (DIM_HEAD, DIM), dtype=jnp.float32) * (DIM ** -0.5)
    wk = jax.random.normal(k_k, (DIM_HEAD, DIM), dtype=jnp.float32) * (DIM ** -0.5)
    wv = jax.random.normal(k_v, (DIM_HEAD, DIM), dtype=jnp.float32) * (DIM ** -0.5)

    out, attn = cls_query_attention(x, cls_token, wq.T, wk.T, wv.T, scale=scale)
    out = jax.block_until_ready(out)
    attn = jax.block_until_ready(attn)

    out_ref, attn_ref = _reference(x, cls_token, wq.T, wk.T, wv.T, scale)
    assert out.shape == (B, HEADS, DIM_HEAD)
    assert attn.shape == (B, HEADS, N)
    # Tolerances account for the approximate (EUP) reciprocal in the softmax denominator.
    assert jnp.allclose(out, out_ref, atol=2e-3, rtol=2e-3)
    assert jnp.allclose(attn, attn_ref, atol=2e-3, rtol=2e-3)

    print("KERNEL_OK")
</pallas_src>

<mosaic_0001>
module attributes {stable_mosaic.version = 11 : i64} {
  func.func @_cls_query_attn_kernel(%arg0: i32, %arg1: memref<128x32xf32, #tpu.memory_space<vmem>>, %arg2: memref<8x32xf32, #tpu.memory_space<vmem>>, %arg3: memref<32x64xf32, #tpu.memory_space<vmem>>, %arg4: memref<8x8x32xf32, #tpu.memory_space<vmem>>, %arg5: memref<8x8x16xf32, #tpu.memory_space<vmem>>) attributes {dimension_semantics = [#tpu.dimension_semantics<parallel>], iteration_bounds = array<i64: 2>, scalar_prefetch = 0 : i64, scratch_operands = 0 : i64, tpu.core_type = #tpu.core_type<tc>, window_params = [{transform_indices = @transform_0, window_bounds = array<i64: 128, 32>}, {pipeline_mode = #tpu.pipeline_mode<synchronous>, transform_indices = @transform_1, window_bounds = array<i64: 8, 32>}, {pipeline_mode = #tpu.pipeline_mode<synchronous>, transform_indices = @transform_2, window_bounds = array<i64: 32, 64>}, {transform_indices = @transform_3, window_bounds = array<i64: 8, 8, 32>}, {transform_indices = @transform_4, window_bounds = array<i64: 8, 8, 16>}]} {
    %c0 = arith.constant 0 : index
    %c0_0 = arith.constant 0 : index
    %0 = vector.load %arg1[%c0, %c0_0] : memref<128x32xf32, #tpu.memory_space<vmem>>, vector<128x32xf32>
    %c0_1 = arith.constant 0 : index
    %c0_2 = arith.constant 0 : index
    %1 = vector.load %arg3[%c0_1, %c0_2] : memref<32x64xf32, #tpu.memory_space<vmem>>, vector<32x64xf32>
    %cst = arith.constant dense<0.000000e+00> : vector<128x64xf32>
    %2 = tpu.matmul %0, %1, %cst {dimension_numbers = #tpu.dot_dimension_numbers<[1], [0], [0], [1], [0, 0, 1, 1], [], []>} : vector<128x32xf32>, vector<32x64xf32>, vector<128x64xf32> -> vector<128x64xf32>
    %3 = vector.shape_cast %2 : vector<128x64xf32> to vector<8x16x64xf32>
    %4 = vector.extract_strided_slice %3 {offsets = [0, 0, 0], sizes = [8, 16, 32], strides = [1, 1, 1]} : vector<8x16x64xf32> to vector<8x16x32xf32>
    %5 = vector.extract_strided_slice %3 {offsets = [0, 0, 32], sizes = [8, 16, 32], strides = [1, 1, 1]} : vector<8x16x64xf32> to vector<8x16x32xf32>
    %c0_3 = arith.constant 0 : index
    %c0_4 = arith.constant 0 : index
    %6 = vector.load %arg2[%c0_3, %c0_4] : memref<8x32xf32, #tpu.memory_space<vmem>>, vector<8x32xf32>
    %7 = vector.shape_cast %6 : vector<8x32xf32> to vector<1x8x32xf32>
    %8 = vector.broadcast %7 : vector<1x8x32xf32> to vector<8x8x32xf32>
    "tpu.trace_start"() <{level = 10 : i32, message = "bhd,bnd->bhn"}> : () -> ()
    %cst_5 = arith.constant dense<0.000000e+00> : vector<8x8x16xf32>
    %9 = tpu.matmul %8, %4, %cst_5 {dimension_numbers = #tpu.dot_dimension_numbers<[2], [2], [1], [1], [0, 0, 0, 1, 1, 1], [0], [0]>} : vector<8x8x32xf32>, vector<8x16x32xf32>, vector<8x8x16xf32> -> vector<8x8x16xf32>
    "tpu.trace_stop"() : () -> ()
    %cst_6 = arith.constant 0.176776692 : f32
    %10 = vector.broadcast %cst_6 : f32 to vector<8x8x16xf32>
    %11 = arith.mulf %9, %10 : vector<8x8x16xf32>
    %cst_7 = arith.constant dense<0xFF800000> : vector<8x8xf32>
    %12 = vector.multi_reduction <maximumf>, %11, %cst_7 [2] : vector<8x8x16xf32> to vector<8x8xf32>
    %13 = vector.shape_cast %12 : vector<8x8xf32> to vector<8x8x1xf32>
    %14 = vector.broadcast %13 : vector<8x8x1xf32> to vector<8x8x16xf32>
    %15 = arith.subf %11, %14 : vector<8x8x16xf32>
    %16 = math.exp %15 : vector<8x8x16xf32>
    %cst_8 = arith.constant dense<0.000000e+00> : vector<8x8xf32>
    %17 = vector.multi_reduction <add>, %16, %cst_8 [2] : vector<8x8x16xf32> to vector<8x8xf32>
    %18 = vector.shape_cast %17 : vector<8x8xf32> to vector<8x8x1xf32>
    %19 = tpu.reciprocal %18 {approx = true} : vector<8x8x1xf32> -> vector<8x8x1xf32>
    %20 = vector.broadcast %19 : vector<8x8x1xf32> to vector<8x8x16xf32>
    %21 = arith.mulf %16, %20 : vector<8x8x16xf32>
    "tpu.trace_start"() <{level = 10 : i32, message = "bhn,bnd->bhd"}> : () -> ()
    %cst_9 = arith.constant dense<0.000000e+00> : vector<8x8x32xf32>
    %22 = tpu.matmul %21, %5, %cst_9 {dimension_numbers = #tpu.dot_dimension_numbers<[2], [1], [1], [2], [0, 0, 0, 1, 1, 2], [0], [0]>} : vector<8x8x16xf32>, vector<8x16x32xf32>, vector<8x8x32xf32> -> vector<8x8x32xf32>
    "tpu.trace_stop"() : () -> ()
    %c0_10 = arith.constant 0 : index
    %c0_11 = arith.constant 0 : index
    %c0_12 = arith.constant 0 : index
    %23 = vector.load %arg4[%c0_10, %c0_11, %c0_12] : memref<8x8x32xf32, #tpu.memory_space<vmem>>, vector<8x8x32xf32>
    tpu.vector_store %arg4[%c0_10, %c0_11, %c0_12], %22 {strides = array<i32>} : memref<8x8x32xf32, #tpu.memory_space<vmem>>, vector<8x8x32xf32>,
    %c0_13 = arith.constant 0 : index
    %c0_14 = arith.constant 0 : index
    %c0_15 = arith.constant 0 : index
    %24 = vector.load %arg5[%c0_13, %c0_14, %c0_15] : memref<8x8x16xf32, #tpu.memory_space<vmem>>, vector<8x8x16xf32>
    tpu.vector_store %arg5[%c0_13, %c0_14, %c0_15], %21 {strides = array<i32>} : memref<8x8x16xf32, #tpu.memory_space<vmem>>, vector<8x8x16xf32>,
    return
  }
  func.func @transform_0(%arg0: i32) -> (i32, i32) {
    %c0_i32 = arith.constant 0 : i32
    %c0_i32_0 = arith.constant 0 : i32
    return %arg0, %c0_i32 : i32, i32
  }
  func.func @transform_1(%arg0: i32) -> (i32, i32) {
    %c0_i32 = arith.constant 0 : i32
    %c0_i32_0 = arith.constant 0 : i32
    %c0_i32_1 = arith.constant 0 : i32
    return %c0_i32, %c0_i32_0 : i32, i32
  }
  func.func @transform_2(%arg0: i32) -> (i32, i32) {
    %c0_i32 = arith.constant 0 : i32
    %c0_i32_0 = arith.constant 0 : i32
    %c0_i32_1 = arith.constant 0 : i32
    return %c0_i32, %c0_i32_0 : i32, i32
  }
  func.func @transform_3(%arg0: i32) -> (i32, i32, i32) {
    %c0_i32 = arith.constant 0 : i32
    %c0_i32_0 = arith.constant 0 : i32
    %c0_i32_1 = arith.constant 0 : i32
    return %arg0, %c0_i32, %c0_i32_0 : i32, i32, i32
  }
  func.func @transform_4(%arg0: i32) -> (i32, i32, i32) {
    %c0_i32 = arith.constant 0 : i32
    %c0_i32_0 = arith.constant 0 : i32
    %c0_i32_1 = arith.constant 0 : i32
    return %arg0, %c0_i32, %c0_i32_0 : i32, i32, i32
  }
}

</mosaic_0001>

<bundles_post_ra>
// kernel: tpu_custom_call.1
= control target key start
LH: loop header
LB: loop body
LE: loop exit
PB: predicated region body
PF: predicated region fallthrough
CT: control target
= control target key end

     0   :  { %10 = vsyncpa [#allocation3], 0  ;;  %s2964_s0 = inlined_call_operand.vmem [shape: f32[256,32], index: 0, kind: input, shape index: {}]   ;;  %s2965_s1 = inlined_call_operand.vmem [shape: f32[8,32], index: 1, kind: input, shape index: {}]   ;;  %s2966_s2 = inlined_call_operand.vmem [shape: f32[32,64], index: 2, kind: input, shape index: {}]   ;;  %s2967_s3 = inlined_call_operand.hbm [shape: f32[16,8,32], index: 3, kind: output, shape index: {0}]   ;;  %s2968_s4 = inlined_call_operand.hbm [shape: f32[16,8,16], index: 4, kind: output, shape index: {1}]  }
   0x1   :  { %12 = vsyncpa [#allocation3 + $0x1], 0 }
   0x2   :  { %13 = vsyncpa [#allocation5], 0 }
   0x3   :  { %15 = vsyncpa [#allocation5 + $0x1], 0  ;;  %s2504_s15 = smov 0   ;;  %s2506_s16 = smov 0  }
   0x4   :  { %s2508_s17 = smov 0   ;;  %s2510_s18 = smov 0  }
   0x5 LB: > { %s2525_s19 = sadd.s32 4294967295, %s2469_s18   ;;  %s1911_s20 = sadd.s32 4294967294, %s2469_s18   ;;  %s2469_s18 = sphi %s2510_s18, %s2976_s18   ;;  %s2465_s17 = sphi %s2508_s17, %s2975_s17   ;;  %s2461_s16 = sphi %s2506_s16, %s2974_s16   ;;  %s2457_s15 = sphi %s2504_s15, %s2973_s15  }
   0x6   : > { %s2529_s21 = sadd.s32 1, %s2469_s18   ;;  %s96_s22 = sadd.s32 1, %s2465_s17 }
   0x7   : > { %s93_s23 = ssub.s32 %s2469_s18, %s2529_s21  ;;  %p106_p0 = scmp.ne.s32.totalorder %s2465_s17, %s2461_s16 }
   0x8   : > { %p94_p1 = scmp.eq.s32.totalorder %s93_s23, 0  ;;  %p107_p2 = scmp.eq.s32.totalorder %s2525_s19, 1 }
   0x9   : > { %p112_p3 = scmp.ne.s32.totalorder %s2461_s16, %s2457_s15  ;;  %p113_p4 = scmp.eq.s32.totalorder %s1911_s20, 1 }
   0xa   : > { %s2540_s24 = scalar_select %p94_p1, %s2465_s17, %s96_s22  }
   0xb   : > { %p2542_p5 = por %p107_p2, %p106_p0  ;;  %p2546_p6 = por %p113_p4, %p112_p3 }
   0xc   : > { %p1914_p7 = scmp.ge.s32.totalorder %s2469_s18, 1  ;;  %p172_p8 = scmp.lt.s32.totalorder %s2469_s18, 3 }
   0xe   : > { %p173_p9 = pnand %p1914_p7, %p172_p8 }
   0xf   : > { %v227_v0 = vld [vmem:[%s2966_s2] sm:$0xff] (!%p173_p9)  ;;  %v228_v1 = vld [vmem:[%s2966_s2 + $0x8] sm:$0xff] (!%p173_p9)  ;;  %v229_v2 = vld [vmem:[%s2966_s2 + $0x10] sm:$0xff] (!%p173_p9)  ;;  %s1917_s7 = sshll.u32 (!%p173_p9), %s2525_s19, 4  ;;  %vm231_vm0 = vcmask (!%p173_p9), 261120   ;;  %v2471_v22 = vmov (!%p173_p9), 0.0|0.0  }
  0x10   : > { %176 = sbr.rel (%p173_p9) target bundleno = 1044 (0x414), region = 32  ;;  %v2189_v3 = vpack.c.bf16 (!%p173_p9), %v228_v1, %v227_v0  ;;  %v230_v4 = vld [vmem:[%s2966_s2 + $0x18] sm:$0xff] (!%p173_p9)  ;;  %p204_p10 = scmp.lt.s32.totalorder (!%p173_p9), %s1917_s7, 31  ;;  %2197 = vmatprep.subr.bf16.mxu1 (!%p173_p9), %v2471_v22  ;;  %vm2472_vm1 = vmmov (!%p173_p9), 0   ;;  %v2473_v23 = vmov (!%p173_p9), 0.0   ;;  %vm2614_vm2 = vmpackc.low (!%p173_p9), %vm231_vm0, %vm231_vm0  ;;  %v425_v34 = vld [vmem:[%s2965_s1] sm:$0xff] (!%p173_p9) }
  0x11   : > { %v2193_v5 = vpack.c.bf16 (!%p173_p9), %v230_v4, %v229_v2  ;;  %2081 = vmatprep.mubr.msk.f32.mxu1 (!%p173_p9), %vm2472_vm1, %v2473_v23  ;;  %vm1045_vm3 = vcmask (!%p173_p9), 130048   ;;  %s2474_s22 = smov (!%p173_p9), 96   ;;  %s2808_s23 = sand.u32 (!%p173_p9), 1, %s2461_s16  }
  0x12   : > { %2190 = vmatprep.subr.bf16.mxu0 (!%p173_p9), %v2189_v3  ;;  %s1915_s27 = sshll.u32 (!%p173_p9), %s2808_s23, 6  ;;  %s1975_s29 = sshll.u32 (!%p173_p9), %s2525_s19, 10 }
  0x13   : > { %2192 = vmatpush3.bf16.msra.mxu0 (!%p173_p9), %v2189_v3  ;;  %s2814_s28 = scalar_lea.vmem (!%p173_p9), [#allocation4], %s1915_s27  ;;  %s2869_s6 = scalar_lea.hbm (!%p173_p9), %s2968_s4, %s1975_s29 }
  0x14   : > { %2194 = vmatprep.subr.bf16.mxu0 (!%p173_p9), %v2193_v5  ;;  %s1788_s8 = scalar_lea.sflag (!%p173_p9), [#allocation5], %s2808_s23 }
  0x17   : > { %s2978_s7 = smov (!%p204_p10, %s1917_s7), 31  ;;  %2196 = vmatpush3.bf16.msra.mxu0 %v2193_v5 }
  0x18   : > { %s1918_s10 = sshll.u32 %s2978_s7, 3  ;;  %2213 = vmatprep.subr.bf16.mxu0 %v2471_v22  ;;  %s1817_s7 = sshll.u32 %s2814_s28, 4  ;;  %s2872_s7 = int_to_ptr.vmem [resolvable:$true] %s1817_s7 }
  0x19   : > { %s2568_s13 = scalar_lea.vmem %s2964_s0, %s1918_s10  ;;  %s2375_s9 = scalar_lea.vmem %s2872_s7, 1024 }
  0x1a   : > { %v211_v6 = vld [vmem:[%s2568_s13] sm:$0xff]  ;;  %v212_v7 = vld [vmem:[%s2568_s13 + $0x8] sm:$0xff]  ;;  %v213_v8 = vld [vmem:[%s2568_s13 + $0x10] sm:$0xff]  ;;  %p2376_p11 = scmp.ne.s32.totalorder %s2872_s7, %s2375_s9  ;;  %s2475_s10 = smov [#allocation4]  }
  0x1b   : > { %2053 = vmatprep.mubr.msk.f32.mxu0 %vm231_vm0, %v211_v6  ;;  %v214_v9 = vld [vmem:[%s2568_s13 + $0x18] sm:$0xff]  ;;  %v215_v10 = vld [vmem:[%s2568_s13 + $0x20] sm:$0xff]  ;;  %v216_v11 = vld [vmem:[%s2568_s13 + $0x28] sm:$0xff]  ;;  %s2379_s11 = sshll.u32 %s2475_s10, 4  ;;  %s2380_s11 = int_to_ptr.vmem [resolvable:$false] %s2379_s11 }
  0x1c   : > { %2054 = vmatmul.mubr.msk.f32.vlgmr.msra.gmra.mrb[0].mxu0 %vm231_vm0, %v212_v7  ;;  %v217_v12 = vld [vmem:[%s2568_s13 + $0x30] sm:$0xff]  ;;  %v218_v13 = vld [vmem:[%s2568_s13 + $0x38] sm:$0xff]  ;;  %v219_v14 = vld [vmem:[%s2568_s13 + $0x40] sm:$0xff]  ;;  %p2377_p12 = pnand %p2376_p11, %p2542_p5  ;;  %s2381_s12 = scalar_lea.vmem %s2380_s11, 2048 }
  0x1d   : > { %2056 = vmatprep.mubr.msk.f32.mxu0 %vm231_vm0, %v213_v8  ;;  %v220_v15 = vld [vmem:[%s2568_s13 + $0x48] sm:$0xff]  ;;  %v221_v16 = vld [vmem:[%s2568_s13 + $0x50] sm:$0xff]  ;;  %v222_v17 = vld [vmem:[%s2568_s13 + $0x58] sm:$0xff]  ;;  %p2382_p0 = scmp.lt.s32.totalorder %s2872_s7, %s2380_s11  ;;  %p2383_p1 = scmp.lt.s32.totalorder %s2381_s12, %s2375_s9 }
  0x1e   : > { %v223_v18 = vld [vmem:[%s2568_s13 + $0x60] sm:$0xff]  ;;  %v224_v19 = vld [vmem:[%s2568_s13 + $0x68] sm:$0xff]  ;;  %v225_v20 = vld [vmem:[%s2568_s13 + $0x70] sm:$0xff]  ;;  %p2378_p13 = pneg %p2377_p12 }
  0x1f   : > { %v226_v21 = vld [vmem:[%s2568_s13 + $0x78] sm:$0xff]  ;;  %p2384_p2 = por %p2383_p1, %p2382_p0 }
  0x20   : > { %2057 = vmatmul.mubr.msk.f32.gmra.mrb[2].mxu0 %vm231_vm0, %v214_v9 }
  0x21   : > { %2059 = vmatprep.mubr.msk.f32.mxu0 %vm231_vm0, %v215_v10  ;;  %p2385_p3 = pnand %p2384_p2, %p2378_p13 }
  0x24   : > { %2060 = vmatmul.mubr.msk.f32.gmra.mrb[4].mxu0 %vm231_vm0, %v216_v11 }
  0x25   : > { %2062 = vmatprep.mubr.msk.f32.mxu0 %vm231_vm0, %v217_v12 }
  0x28   : > { %2063 = vmatmul.mubr.msk.f32.gmra.mrb[6].mxu0 %vm231_vm0, %v218_v13 }
  0x29   : > { %2065 = vmatprep.mubr.msk.f32.mxu0 %vm231_vm0, %v219_v14 }
  0x2c   : > { %2066 = vmatmul.mubr.msk.f32.gmra.mrb[8].mxu0 %vm231_vm0, %v220_v15 }
  0x2d   : > { %2068 = vmatprep.mubr.msk.f32.mxu0 %vm231_vm0, %v221_v16 }
  0x30   : > { %2069 = vmatmul.mubr.msk.f32.gmra.mrb[10].mxu0 %vm231_vm0, %v222_v17 }
  0x31   : > { %2071 = vmatprep.mubr.msk.f32.mxu0 %vm231_vm0, %v223_v18 }
  0x34   : > { %2072 = vmatmul.mubr.msk.f32.gmra.mrb[12].mxu0 %vm231_vm0, %v224_v19 }
  0x35   : > { %2074 = vmatprep.mubr.msk.f32.mxu0 %vm231_vm0, %v225_v20 }
  0x38   : > { %2075 = vmatmul.mubr.msk.f32.gmra.mrb[14].mxu0 %vm231_vm0, %v226_v21 }
  0x39   : > { %2109 = vmatprep.mubr.msk.f32.mxu0 %vm2472_vm1, %v2473_v23 }
  0xef   : > { %v2608_v24 = vpop.f32.mrb[0].mxu0 }
  0xf0   : > { %v2610_v25 = vpop.f32.mrb[1].mxu0 }
  0xf1   : > { %v2303_v27 = vpack.i.bf16 %v2608_v24, %v2610_v25  ;;  %v2198_v28 = vpack.c.bf16 %v2608_v24, %v2610_v25 }
  0xf3   : > { %v2622_v29 = vpop.f32.mrb[2].mxu0  ;;  %2200 = vmatpush3.bf16.xpose.msk.msra.mxu1 %vm2614_vm2, %v2198_v28 }
  0xf4   : > { %v2626_v30 = vpop.f32.mrb[3].mxu0  ;;  %2201 = vmatprep.subr.bf16.mxu1 %v2471_v22 }
  0xf5   : > { %v2308_v31 = vpack.i.bf16 %v2622_v29, %v2626_v30  ;;  %v2202_v32 = vpack.c.bf16 %v2622_v29, %v2626_v30 }
  0xf7   : > { %v2633_v33 = vpop.f32.mrb[4].mxu0 }
  0xf8   : > { %v2638_v35 = vpop.f32.mrb[5].mxu0 }
  0xf9   : > { %v2313_v36 = vpack.i.bf16 %v2633_v33, %v2638_v35  ;;  %v2206_v37 = vpack.c.bf16 %v2633_v33, %v2638_v35 }
  0xfa   : > { %2082 = vmatmul.mubr.msk.f32.vlgmr.msra.gmra.mrb[0].mxu1 %vm231_vm0, %v425_v34 }
  0xfb   : > { %v2645_v38 = vpop.f32.mrb[6].mxu0  ;;  %2204 = vmatpush3.bf16.xpose.msk.msra.mxu1 %vm2614_vm2, %v2202_v32  ;;  %2088 = vmatprep.mubr.msk.f32.mxu1 %vm2472_vm1, %v2473_v23 }
  0xfc   : > { %v2651_v39 = vpop.f32.mrb[7].mxu0  ;;  %2205 = vmatprep.subr.bf16.mxu1 %v2471_v22 }
  0xfd   : > { %v2318_v40 = vpack.i.bf16 %v2645_v38, %v2651_v39  ;;  %v2210_v41 = vpack.c.bf16 %v2645_v38, %v2651_v39 }
  0xff   : > { %v2658_v42 = vpop.f32.mrb[8].mxu0 }
 0x100   : > { %v2660_v43 = vpop.f32.mrb[9].mxu0 }
 0x101   : > { %v2323_v44 = vpack.i.bf16 %v2658_v42, %v2660_v43  ;;  %v2214_v45 = vpack.c.bf16 %v2658_v42, %v2660_v43 }
 0x102   : > { %2089 = vmatmul.mubr.msk.f32.vlgmr.msra.gmra.mrb[2].mxu1 %vm231_vm0, %v425_v34 }
 0x103   : > { %2208 = vmatpush3.bf16.xpose.msk.msra.mxu1 %vm2614_vm2, %v2206_v37  ;;  %2216 = vmatpush3.bf16.xpose.msk.msra.mxu0 %vm2614_vm2, %v2214_v45  ;;  %v2671_v46 = vpop.f32.mrb[10].mxu0 }
 0x104   : > { %v2673_v47 = vpop.f32.mrb[11].mxu0  ;;  %2095 = vmatprep.mubr.msk.f32.mxu1 %vm2472_vm1, %v2473_v23  ;;  %2209 = vmatprep.subr.bf16.mxu1 %v2471_v22 }
 0x105   : > { %v2328_v48 = vpack.i.bf16 %v2671_v46, %v2673_v47  ;;  %v2218_v49 = vpack.c.bf16 %v2671_v46, %v2673_v47  ;;  %2221 = vmatprep.subr.bf16.mxu0 %v2471_v22 }
 0x107   : > { %v2683_v50 = vpop.f32.mrb[12].mxu0 }
 0x108   : > { %v2685_v51 = vpop.f32.mrb[13].mxu0 }
 0x109   : > { %v2333_v52 = vpack.i.bf16 %v2683_v50, %v2685_v51  ;;  %v2222_v53 = vpack.c.bf16 %v2683_v50, %v2685_v51 }
 0x10a   : > { %2096 = vmatmul.mubr.msk.f32.vlgmr.msra.gmra.mrb[4].mxu1 %vm231_vm0, %v425_v34  ;;  %2110 = vmatmul.mubr.msk.f32.vlgmr.msra.gmra.mrb[16].mxu0 %vm231_vm0, %v425_v34 }
 0x10b   : > { %2212 = vmatpush3.bf16.xpose.msk.msra.mxu1 %vm2614_vm2, %v2210_v41  ;;  %2224 = vmatpush3.bf16.xpose.msk.msra.mxu0 %vm2614_vm2, %v2222_v53  ;;  %v2697_v54 = vpop.f32.mrb[14].mxu0 }
 0x10c   : > { %2102 = vmatprep.mubr.msk.f32.mxu1 %vm2472_vm1, %v2473_v23  ;;  %2123 = vmatprep.mubr.msk.f32.mxu0 %vm2472_vm1, %v2473_v23  ;;  %v2703_v55 = vpop.f32.mrb[15].mxu0 }
 0x10d   : > { %2217 = vmatprep.subr.bf16.mxu1 %v2471_v22  ;;  %v2338_v56 = vpack.i.bf16 %v2697_v54, %v2703_v55  ;;  %v2226_v57 = vpack.c.bf16 %v2697_v54, %v2703_v55  ;;  %2229 = vmatprep.subr.bf16.mxu0 %v2471_v22 }
 0x112   : > { %2103 = vmatmul.mubr.msk.f32.vlgmr.msra.gmra.mrb[6].mxu1 %vm231_vm0, %v425_v34  ;;  %2124 = vmatmul.mubr.msk.f32.vlgmr.msra.gmra.mrb[18].mxu0 %vm231_vm0, %v425_v34 }
 0x113   : > { %2220 = vmatpush3.bf16.xpose.msk.msra.mxu1 %vm2614_vm2, %v2218_v49  ;;  %2116 = vmatprep.mubr.msk.f32.mxu1 %vm2472_vm1, %v2473_v23 }
 0x114   : > { %2225 = vmatprep.subr.bf16.mxu1 %v2471_v22  ;;  %2137 = vmatprep.mubr.msk.f32.mxu0 %vm2472_vm1, %v2473_v23 }
 0x11a   : > { %2117 = vmatmul.mubr.msk.f32.vlgmr.msra.gmra.mrb[8].mxu1 %vm231_vm0, %v425_v34 }
 0x11b   : > { %2228 = vmatpush3.bf16.xpose.msk.msra.mxu1 %vm2614_vm2, %v2226_v57  ;;  %2130 = vmatprep.mubr.msk.f32.mxu1 %vm2472_vm1, %v2473_v23 }
 0x11c   : > { %2232 = vmatprep.subr.bf16.mxu1 %v2471_v22 }
 0x122   : > { %2131 = vmatmul.mubr.msk.f32.vlgmr.msra.gmra.mrb[10].mxu1 %vm231_vm0, %v425_v34 }
 0x123   : > { %2144 = vmatprep.mubr.msk.f32.mxu1 %vm2472_vm1, %v2473_v23 }
 0x1cd   : > { %v501_v58 = vpop.f32.mrb[0].mxu1 }
 0x1ce   : > { %v1037_v59 = vmul.f32 0.17677669, %v501_v58  ;;  %v2083_v60 = vpop.f32.mrb[1].mxu1 }
 0x1d0   : > { %v1046_v61 = vsel %vm1045_vm3, %v1037_v59, -inf }
 0x1d1   : > { %1047 = vmax.xlane.f32.xlu0 %v1046_v61 }
 0x1d5   : > { %v577_v62 = vpop.f32.mrb[2].mxu1 }
 0x1d6   : > { %v1038_v63 = vmul.f32 0.17677669, %v577_v62  ;;  %v2090_v0 = vpop.f32.mrb[3].mxu1 }
 0x1d8   : > { %v1049_v1 = vsel %vm1045_vm3, %v1038_v63, -inf }
 0x1d9   : > { %1050 = vmax.xlane.f32.xlu0 %v1049_v1 }
 0x1dd   : > { %v653_v2 = vpop.f32.mrb[4].mxu1  ;;  %v805_v3 = vpop.f32.mrb[16].mxu0 }
 0x1de   : > { %v1039_v4 = vmul.f32 0.17677669, %v653_v2  ;;  %v1041_v5 = vmul.f32 0.17677669, %v805_v3  ;;  %v2097_v6 = vpop.f32.mrb[5].mxu1  ;;  %v2111_v7 = vpop.f32.mrb[17].mxu0 }
 0x1e0   : > { %v1052_v8 = vsel %vm1045_vm3, %v1039_v4, -inf  ;;  %v1058_v9 = vsel %vm1045_vm3, %v1041_v5, -inf }
 0x1e1   : > { %1053 = vmax.xlane.f32.xlu1 %v1052_v8  ;;  %1059 = vmax.xlane.f32.xlu0 %v1058_v9 }
 0x1e5   : > { %v729_v10 = vpop.f32.mrb[6].mxu1  ;;  %v957_v11 = vpop.f32.mrb[18].mxu0 }
 0x1e6   : > { %v1040_v12 = vmul.f32 0.17677669, %v729_v10  ;;  %v1043_v13 = vmul.f32 0.17677669, %v957_v11  ;;  %v2104_v14 = vpop.f32.mrb[7].mxu1  ;;  %v2125_v15 = vpop.f32.mrb[19].mxu0 }
 0x1e8   : > { %v1055_v16 = vsel %vm1045_vm3, %v1040_v12, -inf  ;;  %v1064_v17 = vsel %vm1045_vm3, %v1043_v13, -inf }
 0x1e9   : > { %1056 = vmax.xlane.f32.xlu1 %v1055_v16  ;;  %1065 = vmax.xlane.f32.xlu0 %v1064_v17 }
 0x1ed   : > { %v881_v18 = vpop.f32.mrb[8].mxu1 }
 0x1ee   : > { %v1042_v19 = vmul.f32 0.17677669, %v881_v18  ;;  %v2118_v20 = vpop.f32.mrb[9].mxu1 }
 0x1f0   : > { %v1061_v21 = vsel %vm1045_vm3, %v1042_v19, -inf }
 0x1f1   : > { %1062 = vmax.xlane.f32.xlu1 %v1061_v21 }
 0x1f5   : > { %v1033_v26 = vpop.f32.mrb[10].mxu1 }
 0x1f6   : > { %v2736_v28 = vmul.f32 0.17677669, %v1033_v26  ;;  %v2132_v32 = vpop.f32.mrb[11].mxu1 }
 0x1f8   : > { %v1067_v34 = vsel %vm1045_vm3, %v2736_v28, -inf }
 0x1f9   : > { %1068 = vmax.xlane.f32.xlu1 %v1067_v34 }
 0x1ff   : > { %2304 = vrot.lane.b32.xlu0 %v2303_v27, %s2474_s22 }
 0x203   : > { %2324 = vrot.lane.b32.xlu0 %v2323_v44, %s2474_s22 }
 0x20a   : > { %2309 = vrot.lane.b32.xlu1 %v2308_v31, %s2474_s22 }
 0x20e   : > { %2314 = vrot.lane.b32.xlu1 %v2313_v36, %s2474_s22 }
 0x212   : > { %2319 = vrot.lane.b32.xlu1 %v2318_v40, %s2474_s22 }
 0x216   : > { %2329 = vrot.lane.b32.xlu1 %v2328_v48, %s2474_s22 }
 0x25e   : > { %v1048_v24 = vpop.xlane.xlu0 %1047 }
 0x25f   : > { %v1070_v25 = vsub.f32 %v1037_v59, %v1048_v24 }
 0x261   : > { %v1078_v27 = vmul.f32 1.442695, %v1070_v25 }
 0x263   : > { %2343 = vpow2.f32 %v1078_v27 }
 0x266   : > { %v1051_v29 = vpop.xlane.xlu0 %1050 }
 0x267   : > { %v1071_v30 = vsub.f32 %v1038_v63, %v1051_v29 }
 0x269   : > { %v1080_v31 = vmul.f32 1.442695, %v1071_v30 }
 0x26b   : > { %2345 = vpow2.f32 %v1080_v31 }
 0x26d   : > { %v2764_v33 = vpop.eup %2343 }
 0x26e   : > { %v1054_v35 = vpop.xlane.xlu1 %1053  ;;  %v1060_v36 = vpop.xlane.xlu0 %1059  ;;  %v1094_v37 = vsel %vm1045_vm3, %v2764_v33, 0.0 }
 0x26f   : > { %v1072_v38 = vsub.f32 %v1039_v4, %v1054_v35  ;;  %v1074_v39 = vsub.f32 %v1041_v5, %v1060_v36  ;;  %1095 = vadd.xlane.f32.xlu0 %v1094_v37 }
 0x271   : > { %v1082_v40 = vmul.f32 1.442695, %v1072_v38  ;;  %v1086_v41 = vmul.f32 1.442695, %v1074_v39 }
 0x273   : > { %2347 = vpow2.f32 %v1082_v40 }
 0x274   : > { %2349 = vpow2.f32 %v1086_v41 }
 0x275   : > { %v2768_v42 = vpop.eup %2345 }
 0x276   : > { %v1057_v43 = vpop.xlane.xlu1 %1056  ;;  %v1066_v44 = vpop.xlane.xlu0 %1065  ;;  %v1097_v45 = vsel %vm1045_vm3, %v2768_v42, 0.0 }
 0x277   : > { %v1073_v46 = vsub.f32 %v1040_v12, %v1057_v43  ;;  %v1076_v47 = vsub.f32 %v1043_v13, %v1066_v44  ;;  %1098 = vadd.xlane.f32.xlu1 %v1097_v45 }
 0x279   : > { %v1084_v48 = vmul.f32 1.442695, %v1073_v46  ;;  %v1090_v49 = vmul.f32 1.442695, %v1076_v47 }
 0x27a   : > { %v2305_v53 = vpop.permute.xlu0 %2304 }
 0x27b   : > { %2351 = vpow2.f32 %v1084_v48  ;;  %v2307_v57 = vunpack.i.h.bf16 %v2305_v53  ;;  %v2306_v58 = vunpack.i.l.bf16 %v2305_v53 }
 0x27c   : > { %2353 = vpow2.f32 %v1090_v49 }
 0x27d   : > { %v2772_v59 = vpop.eup %2347  ;;  %v2230_v60 = vpack.c.bf16 %v2307_v57, %v2306_v58 }
 0x27e   : > { %v1063_v61 = vpop.xlane.xlu1 %1062  ;;  %v1100_v62 = vsel %vm1045_vm3, %v2772_v59, 0.0  ;;  %v2776_v63 = vpop.eup %2349 }
 0x27f   : > { %v1075_v0 = vsub.f32 %v1042_v19, %v1063_v61  ;;  %1101 = vadd.xlane.f32.xlu0 %v1100_v62  ;;  %2231 = vmatpush3.bf16.msra.mxu0 %v2230_v60  ;;  %v1106_v2 = vsel %vm1045_vm3, %v2776_v63, 0.0  ;;  %v2325_v19 = vpop.permute.xlu0 %2324 }
 0x280   : > { %2235 = vmatprep.subr.bf16.mxu0 %v2471_v22  ;;  %v2327_v31 = vunpack.i.h.bf16 %v2325_v19 }
 0x281   : > { %v1088_v1 = vmul.f32 1.442695, %v1075_v0 }
 0x283   : > { %2355 = vpow2.f32 %v1088_v1  ;;  %1107 = vadd.xlane.f32.xlu0 %v1106_v2 }
 0x285   : > { %v2781_v3 = vpop.eup %2351 }
 0x286   : > { %v2783_v4 = vpop.eup %2353  ;;  %v1069_v5 = vpop.xlane.xlu1 %1068  ;;  %v1103_v6 = vsel %vm1045_vm3, %v2781_v3, 0.0 }
 0x287   : > { %v1077_v7 = vsub.f32 %v2736_v28, %v1069_v5  ;;  %1104 = vadd.xlane.f32.xlu1 %v1103_v6  ;;  %v1112_v8 = vsel %vm1045_vm3, %v2783_v4, 0.0 }
 0x288   : > { %1113 = vadd.xlane.f32.xlu0 %v1112_v8 }
 0x289   : > { %v1092_v9 = vmul.f32 1.442695, %v1077_v7 }
 0x28a   : > { %v2310_v10 = vpop.permute.xlu1 %2309 }
 0x28b   : > { %2357 = vpow2.f32 %v1092_v9  ;;  %v2312_v11 = vunpack.i.h.bf16 %v2310_v10  ;;  %v2311_v12 = vunpack.i.l.bf16 %v2310_v10 }
 0x28d   : > { %v2790_v13 = vpop.eup %2355  ;;  %v2233_v14 = vpack.c.bf16 %v2312_v11, %v2311_v12 }
 0x28e   : > { %v1109_v15 = vsel %vm1045_vm3, %v2790_v13, 0.0  ;;  %v2315_v18 = vpop.permute.xlu1 %2314 }
 0x28f   : > { %1110 = vadd.xlane.f32.xlu1 %v1109_v15  ;;  %2234 = vmatpush3.bf16.msra.mxu1 %v2233_v14  ;;  %v2317_v32 = vunpack.i.h.bf16 %v2315_v18  ;;  %v2316_v50 = vunpack.i.l.bf16 %v2315_v18 }
 0x290   : > { %2238 = vmatprep.subr.bf16.mxu1 %v2471_v22 }
 0x291   : > { %v2236_v54 = vpack.c.bf16 %v2317_v32, %v2316_v50 }
 0x292   : > { %v2320_v20 = vpop.permute.xlu1 %2319 }
 0x293   : > { %v2321_v34 = vunpack.i.l.bf16 %v2320_v20 }
 0x295   : > { %v2795_v16 = vpop.eup %2357 }
 0x296   : > { %v1115_v17 = vsel %vm1045_vm3, %v2795_v16, 0.0  ;;  %v2330_v26 = vpop.permute.xlu1 %2329 }
 0x297   : > { %1116 = vadd.xlane.f32.xlu1 %v1115_v17  ;;  %v2332_v46 = vunpack.i.h.bf16 %v2330_v26  ;;  %v2331_v47 = vunpack.i.l.bf16 %v2330_v26 }
 0x299   : > { %v2245_v57 = vpack.c.bf16 %v2332_v46, %v2331_v47 }
 0x29e   : > { %2334 = vrot.lane.b32.xlu0 %v2333_v52, %s2474_s22 }
 0x2a8   : > { %2339 = vrot.lane.b32.xlu1 %v2338_v56, %s2474_s22  ;;  %v2322_v56 = vunpack.i.h.bf16 %v2320_v20 }
 0x2aa   : > { %v2239_v29 = vpack.c.bf16 %v2322_v56, %v2321_v34 }
 0x2fc   : > { %v1096_v21 = vpop.xlane.xlu0 %1095 }
 0x2fd   : > { %2359 = vrcp.f32 %v1096_v21 }
 0x304   : > { %v1099_v28 = vpop.xlane.xlu1 %1098 }
 0x305   : > { %2361 = vrcp.f32 %v1099_v28 }
 0x307   : > { %v2360_v51 = vpop.eup %2359 }
 0x308   : > { %v1126_v52 = vmul.f32 %v2360_v51, %v2764_v33  ;;  %v2326_v33 = vunpack.i.l.bf16 %v2325_v19 }
 0x30a   : > { %1774 = vst.msk [vmem:[%s2814_s28] sm:$0xff] %vm1045_vm3, %v1126_v52  ;;  %2138 = vmatmul.mubr.msk.f32.vlgmr.msra.gmra.mrb[20].mxu0 %vm1045_vm3, %v1126_v52  ;;  %v2242_v38 = vpack.c.bf16 %v2327_v31, %v2326_v33 }
 0x30b   : > { %2237 = vmatpush3.bf16.msra.mxu0 %v2236_v54  ;;  %2151 = vmatprep.mubr.msk.f32.mxu0 %vm2472_vm1, %v2473_v23 }
 0x30c   : > { %v1102_v55 = vpop.xlane.xlu0 %1101  ;;  %2241 = vmatprep.subr.bf16.mxu0 %v2471_v22 }
 0x30d   : > { %2363 = vrcp.f32 %v1102_v55 }
 0x30f   : > { %v2362_v24 = vpop.eup %2361 }
 0x310   : > { %v1127_v25 = vmul.f32 %v2362_v24, %v2768_v42  ;;  %v1108_v27 = vpop.xlane.xlu0 %1107 }
 0x311   : > { %2365 = vrcp.f32 %v1108_v27 }
 0x312   : > { %1775 = vst.msk [vmem:[%s2814_s28 + $0x8] sm:$0xff] %vm1045_vm3, %v1127_v25  ;;  %2145 = vmatmul.mubr.msk.f32.vlgmr.msra.gmra.mrb[12].mxu1 %vm1045_vm3, %v1127_v25 }
 0x313   : > { %2240 = vmatpush3.bf16.msra.mxu1 %v2239_v29  ;;  %2158 = vmatprep.mubr.msk.f32.mxu1 %vm2472_vm1, %v2473_v23 }
 0x314   : > { %v1105_v30 = vpop.xlane.xlu1 %1104  ;;  %2244 = vmatprep.subr.bf16.mxu1 %v2471_v22 }
 0x315   : > { %2367 = vrcp.f32 %v1105_v30  ;;  %v1114_v35 = vpop.xlane.xlu0 %1113 }
 0x316   : > { %2369 = vrcp.f32 %v1114_v35 }
 0x317   : > { %v2364_v36 = vpop.eup %2363 }
 0x318   : > { %v1128_v37 = vmul.f32 %v2364_v36, %v2772_v59 }
 0x319   : > { %v2335_v39 = vpop.permute.xlu0 %2334 }
 0x31a   : > { %1776 = vst.msk [vmem:[%s2814_s28 + $0x10] sm:$0xff] %vm1045_vm3, %v1128_v37  ;;  %v2337_v40 = vunpack.i.h.bf16 %v2335_v39  ;;  %v2336_v41 = vunpack.i.l.bf16 %v2335_v39  ;;  %2152 = vmatmul.mubr.msk.f32.vlgmr.msra.gmra.mrb[22].mxu0 %vm1045_vm3, %v1128_v37 }
 0x31b   : > { %v2366_v42 = vpop.eup %2365  ;;  %2243 = vmatpush3.bf16.msra.mxu0 %v2242_v38  ;;  %2165 = vmatprep.mubr.msk.f32.mxu0 %vm2472_vm1, %v2473_v23 }
 0x31c   : > { %v1130_v43 = vmul.f32 %v2366_v42, %v2776_v63  ;;  %v2248_v44 = vpack.c.bf16 %v2337_v40, %v2336_v41  ;;  %v1111_v45 = vpop.xlane.xlu1 %1110  ;;  %2247 = vmatprep.subr.bf16.mxu0 %v2471_v22 }
 0x31d   : > { %2371 = vrcp.f32 %v1111_v45 }
 0x31e   : > { %1778 = vst.msk [vmem:[%s2814_s28 + $0x20] sm:$0xff] %vm1045_vm3, %v1130_v43  ;;  %2166 = vmatmul.mubr.msk.f32.vlgmr.msra.gmra.mrb[24].mxu0 %vm1045_vm3, %v1130_v43 }
 0x31f   : > { %v2368_v48 = vpop.eup %2367  ;;  %2249 = vmatpush3.bf16.msra.mxu0 %v2248_v44  ;;  %2179 = vmatprep.mubr.msk.f32.mxu0 %vm2472_vm1, %v2473_v23 }
 0x320   : > { %v2370_v49 = vpop.eup %2369  ;;  %v1129_v53 = vmul.f32 %v2368_v48, %v2781_v3 }
 0x321   : > { %v1132_v58 = vmul.f32 %v2370_v49, %v2783_v4 }
 0x322   : > { %1777 = vst.msk [vmem:[%s2814_s28 + $0x18] sm:$0xff] %vm1045_vm3, %v1129_v53  ;;  %2159 = vmatmul.mubr.msk.f32.vlgmr.msra.gmra.mrb[14].mxu1 %vm1045_vm3, %v1129_v53 }
 0x323   : > { %1780 = vst.msk [vmem:[%s2814_s28 + $0x30] sm:$0xff] %vm1045_vm3, %v1132_v58  ;;  %2246 = vmatpush3.bf16.msra.mxu1 %v2245_v57  ;;  %2180 = vmatmul.mubr.msk.f32.vlgmr.msra.gmra.mrb[26].mxu0 %vm1045_vm3, %v1132_v58 }
 0x324   : > { %v1117_v59 = vpop.xlane.xlu1 %1116  ;;  %2172 = vmatprep.mubr.msk.f32.mxu1 %vm2472_vm1, %v2473_v23  ;;  %2250 = vmatprep.subr.bf16.mxu1 %v2471_v22 }
 0x325   : > { %2373 = vrcp.f32 %v1117_v59 }
 0x327   : > { %v2372_v60 = vpop.eup %2371 }
 0x328   : > { %v1131_v61 = vmul.f32 %v2372_v60, %v2790_v13  ;;  %v2340_v62 = vpop.permute.xlu1 %2339 }
 0x329   : > { %v2342_v63 = vunpack.i.h.bf16 %v2340_v62  ;;  %v2341_v0 = vunpack.i.l.bf16 %v2340_v62 }
 0x32a   : > { %1779 = vst.msk [vmem:[%s2814_s28 + $0x28] sm:$0xff] %vm1045_vm3, %v1131_v61  ;;  %2173 = vmatmul.mubr.msk.f32.vlgmr.msra.gmra.mrb[16].mxu1 %vm1045_vm3, %v1131_v61 }
 0x32b   : > { %v2251_v1 = vpack.c.bf16 %v2342_v63, %v2341_v0  ;;  %2186 = vmatprep.mubr.msk.f32.mxu1 %vm2472_vm1, %v2473_v23 }
 0x32d   : > { %2252 = vmatpush3.bf16.msra.mxu1 %v2251_v1 }
 0x32f   : > { %v2374_v22 = vpop.eup %2373 }
 0x330   : > { %v1133_v2 = vmul.f32 %v2374_v22, %v2795_v16 }
 0x332   : > { %1781 = vst.msk [vmem:[%s2814_s28 + $0x38] sm:$0xff] %vm1045_vm3, %v1133_v2  ;;  %2187 = vmatmul.mubr.msk.f32.vlgmr.msra.gmra.mrb[18].mxu1 %vm1045_vm3, %v1133_v2 }
 0x333   : > { %2388 = shalt.err (!%p2385_p3)
}
 0x334   : > { %s2389_s13 = scalar_lea.hbm %s2869_s6, 1024  ;;  %s2393_s22 = scalar_lea.hbm %s2968_s4, 2048 }
 0x335   : > { %p2390_p4 = scmp.ne.s32.totalorder %s2869_s6, %s2389_s13  ;;  %p2394_p9 = scmp.lt.u32.totalorder %s2869_s6, %s2968_s4 }
 0x336   : > { %p2395_p10 = scmp.lt.u32.totalorder %s2393_s22, %s2389_s13  ;;  %p2397_p12 = scmp.lt.u32.totalorder %s2389_s13, %s2869_s6 }
 0x337   : > { %p2391_p7 = pnand %p2390_p4, %p2542_p5 }
 0x338   : > { %p2396_p11 = por %p2395_p10, %p2394_p9 }
 0x339   : > { %p2392_p8 = pneg %p2391_p7 }
 0x33a   : > { %p2398_p13 = por %p2397_p12, %p2396_p11 }
 0x33c   : > { %p2399_p0 = pnand %p2398_p13, %p2392_p8 }
 0x33e   : > { %2402 = shalt.err (!%p2399_p0)
}
 0x33f   : > { %s2476_s5 = smov 128   ;;  %s2477_s9 = smov 8  }
 0x340   : > { %2254 = dma.vmem_to_hbm [thread:$0]  (%p2542_p5), %s2872_s7, 1024, %s2869_s6, %s1788_s8, %s2476_s5, %s2476_s5, %s2477_s9  }
 0x341   : > { %s195_s10 = scalar_lea.vmem [#allocation2], %s1915_s27  ;;  %s2915_s8 = scalar_lea.hbm %s2967_s3, %s1975_s29 }
 0x342   : > { %s1801_s27 = sshll.u32 %s195_s10, 4  ;;  %s1783_s11 = scalar_lea.sflag [#allocation3], %s2808_s23  ;;  %s2917_s27 = int_to_ptr.vmem [resolvable:$true] %s1801_s27 }
 0x343   : > { %s2403_s12 = scalar_lea.vmem %s2917_s27, 1024  ;;  %s2478_s19 = smov [#allocation2]  }
 0x344   : > { %p2404_p1 = scmp.ne.s32.totalorder %s2917_s27, %s2403_s12  ;;  %s2407_s13 = sshll.u32 %s2478_s19, 4  ;;  %s2408_s13 = int_to_ptr.vmem [resolvable:$false] %s2407_s13 }
 0x345   : > { %s2409_s29 = scalar_lea.vmem %s2408_s13, 2048  ;;  %p2410_p4 = scmp.lt.s32.totalorder %s2917_s27, %s2408_s13 }
 0x346   : > { %p2405_p2 = pnand %p2404_p1, %p2542_p5  ;;  %p2411_p7 = scmp.lt.s32.totalorder %s2409_s29, %s2403_s12 }
 0x348   : > { %p2406_p3 = pneg %p2405_p2  ;;  %p2412_p8 = por %p2411_p7, %p2410_p4 }
 0x34a   : > { %p2413_p9 = pnand %p2412_p8, %p2406_p3 }
 0x3dd   : > { %v1209_v23 = vpop.f32.mrb[20].mxu0 }
 0x3de   : > { %1766 = vst.msk [vmem:[%s195_s10] sm:$0xff] %vm231_vm0, %v1209_v23  ;;  %v2139_v3 = vpop.f32.mrb[21].mxu0 }
 0x3e5   : > { %v1288_v4 = vpop.f32.mrb[12].mxu1 }
 0x3e6   : > { %1767 = vst.msk [vmem:[%s195_s10 + $0x8] sm:$0xff] %vm231_vm0, %v1288_v4  ;;  %v2146_v5 = vpop.f32.mrb[13].mxu1 }
 0x3ed   : > { %v1367_v6 = vpop.f32.mrb[22].mxu0 }
 0x3ee   : > { %1768 = vst.msk [vmem:[%s195_s10 + $0x10] sm:$0xff] %vm231_vm0, %v1367_v6  ;;  %v2153_v7 = vpop.f32.mrb[23].mxu0 }
 0x3f1   : > { %v1525_v8 = vpop.f32.mrb[24].mxu0 }
 0x3f2   : > { %1770 = vst.msk [vmem:[%s195_s10 + $0x20] sm:$0xff] %vm231_vm0, %v1525_v8  ;;  %v2167_v9 = vpop.f32.mrb[25].mxu0 }
 0x3f5   : > { %v1446_v10 = vpop.f32.mrb[14].mxu1 }
 0x3f6   : > { %1769 = vst.msk [vmem:[%s195_s10 + $0x18] sm:$0xff] %vm231_vm0, %v1446_v10  ;;  %v1683_v11 = vpop.f32.mrb[26].mxu0  ;;  %v2160_v12 = vpop.f32.mrb[15].mxu1 }
 0x3f7   : > { %1772 = vst.msk [vmem:[%s195_s10 + $0x30] sm:$0xff] %vm231_vm0, %v1683_v11  ;;  %v2181_v13 = vpop.f32.mrb[27].mxu0 }
 0x3fd   : > { %v1604_v14 = vpop.f32.mrb[16].mxu1 }
 0x3fe   : > { %1771 = vst.msk [vmem:[%s195_s10 + $0x28] sm:$0xff] %vm231_vm0, %v1604_v14  ;;  %v2174_v15 = vpop.f32.mrb[17].mxu1 }
 0x405   : > { %v1762_v16 = vpop.f32.mrb[18].mxu1 }
 0x406   : > { %1773 = vst.msk [vmem:[%s195_s10 + $0x38] sm:$0xff] %vm231_vm0, %v1762_v16  ;;  %v2188_v17 = vpop.f32.mrb[19].mxu1 }
 0x407   : > { %2416 = shalt.err (!%p2413_p9)
}
 0x408   : > { %s2417_s14 = scalar_lea.hbm %s2915_s8, 1024  ;;  %s2421_s28 = scalar_lea.hbm %s2967_s3, 2048 }
 0x409   : > { %p2418_p10 = scmp.ne.s32.totalorder %s2915_s8, %s2417_s14  ;;  %p2422_p13 = scmp.lt.u32.totalorder %s2915_s8, %s2967_s3 }
 0x40a   : > { %p2423_p0 = scmp.lt.u32.totalorder %s2421_s28, %s2417_s14  ;;  %p2425_p2 = scmp.lt.u32.totalorder %s2417_s14, %s2915_s8 }
 0x40b   : > { %p2419_p11 = pnand %p2418_p10, %p2542_p5 }
 0x40c   : > { %p2424_p1 = por %p2423_p0, %p2422_p13 }
 0x40d   : > { %p2420_p12 = pneg %p2419_p11 }
 0x40e   : > { %p2426_p3 = por %p2425_p2, %p2424_p1 }
 0x410   : > { %p2427_p4 = pnand %p2426_p3, %p2420_p12 }
 0x412   : > { %2430 = shalt.err (!%p2427_p4)
}
 0x413   : > { %2253 = dma.vmem_to_hbm [thread:$0]  (%p2542_p5), %s2917_s27, 1024, %s2915_s8, %s1783_s11, %s2476_s5, %s2476_s5, %s2477_s9  }
 0x414 PF: > { %p2264_p7 = scmp.ge.s32.totalorder %s2469_s18, 2  ;;  %s1832_s6 = sand.u32 1, %s2457_s15  }
 0x415   : > { %s1833_s7 = scalar_lea.sflag [#allocation3], %s1832_s6 }
 0x416   : > { %p2258_p8 = pnand %p2264_p7, %p2546_p6 }
 0x418   : > { %2448 = dma.done.wait (!%p2258_p8), %s1833_s7, 1024  }
 0x419   : > { %2450 = vsyncadd (!%p2258_p8), %s1833_s7, 4294966272  ;;  %s1842_s25 = scalar_lea.sflag [#allocation5], %s1832_s6 }
 0x41a   : > { %2452 = dma.done.wait (!%p2258_p8), %s1842_s25, 1024  }
 0x41b   : > { %2454 = vsyncadd (!%p2258_p8), %s1842_s25, 4294966272  ;;  %p18_p5 = scmp.ge.s32.totalorder %s2529_s21, 4   ;;  %s2973_s15 = smov %s2461_s16 }
 0x41c   : > { %s2974_s16 = smov %s2465_s17  ;;  %s2975_s17 = smov %s2540_s24 }
 0x41d   : > { %s2976_s18 = smov %s2529_s21  ;;  %20 = sbr.rel (!%p18_p5) target bundleno = 5 (0x5), region = 84 }
 0x424   :  { %1847 = vsyncpa [#allocation3], 1 }
 0x425   :  { %1849 = vsyncpa [#allocation3 + $0x1], 1 }
 0x426   :  { %1850 = vsyncpa [#allocation5], 1 }
 0x427   :  { %1852 = vsyncpa [#allocation5 + $0x1], 1 }

</bundles_post_ra>
